<compile_context>
chip_gen: v7x
topology: tpu7x:2x2x1
jax: 0.10.0
libtpu: 0.0.40
codegen_flags: <defaults>
</compile_context>

<pallas_src>
import numpy as np
import jax
import jax.numpy as jnp
from jax.experimental import pallas as pl
from jax.experimental.pallas import tpu as pltpu

_EPS = 1e-8          # eps in PatchWeightedLossDice.dirloss
_LOG_CLAMP = -100.0  # nn.BCELoss clamps log outputs at -100


def _dot3(a, b):
    # dot product over the (width-3) channel lanes via slice adds: pure VPU,
    # no cross-lane XLU reduction over a mostly-dead vreg.
    p = a * b
    return p[:, 0:1] + p[:, 1:2] + p[:, 2:3]


def patch_weighted_loss_kernel(w_ref, sh_ref, small_ref, out_ref):
    # ---- sh MSE (sum): [2, k, 128] slab, zero padding contributes 0 --------
    diff = sh_ref[0] - sh_ref[1]
    sh_mse = jnp.sum(diff * diff)

    small = small_ref[...]                      # (B, 128), single dense load

    # lane layout: 0 p1 | 1 p2 | 2 ind1 | 3 ind2 | 4:7 d1h | 7:10 d2h
    #              | 10:13 d1g | 13:16 d2g | rest zero-padding
    # ---- fused BCE(sum) for (p1, ind1) and (p2, ind2) ----------------------
    p = small[:, 0:2]
    y = small[:, 2:4]
    logp = jnp.maximum(jnp.log(p), _LOG_CLAMP)
    log1mp = jnp.maximum(jnp.log(1.0 - p), _LOG_CLAMP)
    bce_el = -(y * logp + (1.0 - y) * log1mp)   # (B, 2)
    dir1_bce = jnp.sum(bce_el[:, 0:1])
    dir2_bce = jnp.sum(bce_el[:, 1:2])

    d1h = small[:, 4:7]
    d2h = small[:, 7:10]
    d1g = small[:, 10:13]
    d2g = small[:, 13:16]
    ind2 = small[:, 3:4]

    # ---- dirloss: -sum( (|d_hat . d_gt| + eps) / (|d_hat| + |d_gt| + eps) ) -
    cos1 = _dot3(d1h, d1g)
    norm1 = jnp.sqrt(_dot3(d1h, d1h)) + jnp.sqrt(_dot3(d1g, d1g))
    dir1_cos = -jnp.sum((jnp.abs(cos1) + _EPS) / (norm1 + _EPS))

    cos2 = _dot3(d2h, d2g)
    norm2 = jnp.sqrt(_dot3(d2h, d2h)) + jnp.sqrt(_dot3(d2g, d2g))
    dir2_cos = -jnp.sum((jnp.abs(cos2) + _EPS) / (norm2 + _EPS))

    # ---- sepcos: sum |d1_hat . (d2_hat * ind2_gt)| --------------------------
    sep_cos = jnp.sum(jnp.abs(_dot3(d1h, d2h * ind2)))

    total = (w_ref[0] * sh_mse
             + w_ref[1] * dir1_bce
             + w_ref[2] * dir2_bce
             + w_ref[3] * dir1_cos
             + w_ref[4] * dir2_cos
             + w_ref[5] * sep_cos)

    out_ref[0] = total
    out_ref[1] = sh_mse
    out_ref[2] = dir1_bce
    out_ref[3] = dir2_bce
    out_ref[4] = dir1_cos
    out_ref[5] = dir2_cos
    out_ref[6] = sep_cos


def patch_weighted_loss(out, sh_gt, dir_gt, ind_gt, weight):
    """Pallas implementation of PatchWeightedLossDice.forward.

    Returns (loss_dict, loss) with the same 7 components as the PyTorch module
    (values returned as JAX scalars instead of .item() host floats).
    """
    sh_hat, p1_hat, p2_hat, dir1_hat, dir2_hat = out
    B = sh_hat.shape[0]

    # ---- sh_hat / sh_gt: one lane-dense [2, k, 128] f32 slab ----------------
    n = int(np.prod(sh_hat.shape))
    k = (n + 127) // 128
    pad = k * 128 - n

    def _flat(x):
        x = x.reshape(-1).astype(jnp.float32)
        if pad:
            x = jnp.pad(x, (0, pad))          # zero padding -> 0 MSE contribution
        return x.reshape(1, k, 128)

    sh_packed = jnp.concatenate([_flat(sh_hat), _flat(sh_gt)], axis=0)

    # ---- all tiny tensors packed into one [B, 128] array --------------------
    # (center-voxel unpack_gt slicing is folded into this single concat;
    #  the .astype calls are no-ops for f32 inputs and keep bf16 inputs exact)
    small = jnp.concatenate([
        p1_hat.reshape(B, 1).astype(jnp.float32),       # lane 0
        p2_hat.reshape(B, 1).astype(jnp.float32),       # lane 1
        ind_gt[:, 0:1, 1, 1, 1].astype(jnp.float32),    # lane 2     ind1_gt
        ind_gt[:, 1:2, 1, 1, 1].astype(jnp.float32),    # lane 3     ind2_gt
        dir1_hat.reshape(B, 3).astype(jnp.float32),     # lanes 4:7
        dir2_hat.reshape(B, 3).astype(jnp.float32),     # lanes 7:10
        dir_gt[:, 0:3, 1, 1, 1].astype(jnp.float32),    # lanes 10:13 dir1_gt
        dir_gt[:, 3:6, 1, 1, 1].astype(jnp.float32),    # lanes 13:16 dir2_gt
    ], axis=1)
    small = jnp.pad(small, ((0, 0), (0, 128 - small.shape[1])))

    cost = pl.CostEstimate(
        flops=3 * n + 64 * B,
        transcendentals=8 * B,                           # 4B logs + 4B sqrts
        bytes_accessed=4 * (2 * k * 128 + B * 128 + 6 + 7))

    comps = pl.pallas_call(
        patch_weighted_loss_kernel,
        out_shape=jax.ShapeDtypeStruct((7,), jnp.float32),
        in_specs=[pl.BlockSpec(memory_space=pltpu.SMEM),   # weights (scalars)
                  pl.BlockSpec(memory_space=pltpu.VMEM),   # sh slab
                  pl.BlockSpec(memory_space=pltpu.VMEM)],  # packed small tensors
        out_specs=pl.BlockSpec(memory_space=pltpu.SMEM),   # 7 scalar components
        cost_estimate=cost,
    )(weight.astype(jnp.float32), sh_packed, small)

    loss_dict = {
        'total': comps[0],
        'sh_mse': comps[1],
        'dir1_bce': comps[2],
        'dir2_bce': comps[3],
        'dir1_cos': comps[4],
        'dir2_cos': comps[5],
        'sep_cos': comps[6],
    }
    return loss_dict, comps[0]


def _reference_loss(out, sh_gt, dir_gt, ind_gt, weight):
    """Pure-JAX mirror of PatchWeightedLossDice.forward (for verification)."""
    sh_hat, p1_hat, p2_hat, dir1_hat, dir2_hat = out
    ind1_gt = ind_gt[:, 0:1, 1:2, 1:2, 1:2]
    ind2_gt = ind_gt[:, 1:2, 1:2, 1:2, 1:2]
    dir1_gt = dir_gt[:, 0:3, 1:2, 1:2, 1:2]
    dir2_gt = dir_gt[:, 3:6, 1:2, 1:2, 1:2]

    def bce(p, y):
        return -jnp.sum(y * jnp.maximum(jnp.log(p), -100.0)
                        + (1.0 - y) * jnp.maximum(jnp.log(1.0 - p), -100.0))

    def dirloss(dh, dg):
        cos = jnp.sum(dh * dg, axis=1)
        norm = jnp.sqrt(jnp.sum(dh * dh, axis=1)) + jnp.sqrt(jnp.sum(dg * dg, axis=1))
        return -jnp.sum((jnp.abs(cos) + _EPS) / (norm + _EPS))

    def sepcos(d1, d2, ig):
        return jnp.sum(jnp.abs(jnp.sum(d1 * (d2 * ig), axis=1)))

    sh_mse = jnp.sum((sh_hat - sh_gt) ** 2)
    d1b = bce(p1_hat, ind1_gt)
    d2b = bce(p2_hat, ind2_gt)
    d1c = dirloss(dir1_hat, dir1_gt)
    d2c = dirloss(dir2_hat, dir2_gt)
    sep = sepcos(dir1_hat, dir2_hat, ind2_gt)
    total = (weight[0] * sh_mse + weight[1] * d1b + weight[2] * d2b
             + weight[3] * d1c + weight[4] * d2c + weight[5] * sep)
    return {'total': total, 'sh_mse': sh_mse, 'dir1_bce': d1b, 'dir2_bce': d2b,
            'dir1_cos': d1c, 'dir2_cos': d2c, 'sep_cos': sep}


if __name__ == "__main__":
    key = jax.random.PRNGKey(0)
    ks = jax.random.split(key, 8)
    B, C_SH = 2, 9

    # predictions (shapes implied by PatchWeightedLossDice.forward / unpack_gt)
    sh_hat = jax.random.normal(ks[0], (B, C_SH, 3, 3, 3), jnp.float32)
    p1_hat = jax.nn.sigmoid(jax.random.normal(ks[1], (B, 1, 1, 1, 1), jnp.float32))
    p2_hat = jax.nn.sigmoid(jax.random.normal(ks[2], (B, 1, 1, 1, 1), jnp.float32))
    dir1_hat = jax.random.normal(ks[3], (B, 3, 1, 1, 1), jnp.float32)
    dir2_hat = jax.random.normal(ks[4], (B, 3, 1, 1, 1), jnp.float32)

    # ground truth
    sh_gt = jax.random.normal(ks[5], (B, C_SH, 3, 3, 3), jnp.float32)
    dir_gt = jax.random.normal(ks[6], (B, 6, 3, 3, 3), jnp.float32)
    ind_gt = jax.random.bernoulli(ks[7], 0.6, (B, 2, 3, 3, 3)).astype(jnp.float32)

    weight = jnp.array([1.0, 0.5, 0.5, 2.0, 2.0, 1.5], jnp.float32)

    out = (sh_hat, p1_hat, p2_hat, dir1_hat, dir2_hat)
    loss_dict, loss = patch_weighted_loss(out, sh_gt, dir_gt, ind_gt, weight)
    loss = jax.block_until_ready(loss)

    ref = _reference_loss(out, sh_gt, dir_gt, ind_gt, weight)
    for name in ('total', 'sh_mse', 'dir1_bce', 'dir2_bce',
                 'dir1_cos', 'dir2_cos', 'sep_cos'):
        np.testing.assert_allclose(np.asarray(loss_dict[name]),
                                   np.asarray(ref[name]),
                                   rtol=1e-5, atol=1e-5)

    print("KERNEL_OK")
</pallas_src>

<mosaic_0001>
module attributes {stable_mosaic.version = 11 : i64} {
  func.func @patch_weighted_loss_kernel(%arg0: memref<6xf32, #tpu.memory_space<smem>>, %arg1: memref<2x4x128xf32, #tpu.memory_space<vmem>>, %arg2: memref<2x128xf32, #tpu.memory_space<vmem>>, %arg3: memref<7xf32, #tpu.memory_space<smem>>) attributes {dimension_semantics = [], scalar_prefetch = 0 : i64, scratch_operands = 0 : i64, tpu.core_type = #tpu.core_type<tc>} {
    %c0 = arith.constant 0 : index
    %c0_0 = arith.constant 0 : index
    %c0_1 = arith.constant 0 : index
    %0 = vector.load %arg1[%c0, %c0_0, %c0_1] : memref<2x4x128xf32, #tpu.memory_space<vmem>>, vector<1x4x128xf32>
    %1 = vector.shape_cast %0 : vector<1x4x128xf32> to vector<4x128xf32>
    %c1 = arith.constant 1 : index
    %c0_2 = arith.constant 0 : index
    %c0_3 = arith.constant 0 : index
    %2 = vector.load %arg1[%c1, %c0_2, %c0_3] : memref<2x4x128xf32, #tpu.memory_space<vmem>>, vector<1x4x128xf32>
    %3 = vector.shape_cast %2 : vector<1x4x128xf32> to vector<4x128xf32>
    %4 = arith.subf %1, %3 : vector<4x128xf32>
    %5 = arith.mulf %4, %4 : vector<4x128xf32>
    %6 = vector.shape_cast %5 : vector<4x128xf32> to vector<1x4x128xf32>
    %cst = arith.constant dense<0.000000e+00> : vector<1xf32>
    %7 = vector.multi_reduction <add>, %6, %cst [1, 2] : vector<1x4x128xf32> to vector<1xf32>
    %8 = vector.shape_cast %7 : vector<1xf32> to vector<1x1x1xf32>
    %9 = vector.extract %8[0, 0, 0] : f32 from vector<1x1x1xf32>
    %c0_4 = arith.constant 0 : index
    %c0_5 = arith.constant 0 : index
    %10 = vector.load %arg2[%c0_4, %c0_5] : memref<2x128xf32, #tpu.memory_space<vmem>>, vector<2x128xf32>
    %11 = vector.extract_strided_slice %10 {offsets = [0, 0], sizes = [2, 2], strides = [1, 1]} : vector<2x128xf32> to vector<2x2xf32>
    %12 = vector.extract_strided_slice %10 {offsets = [0, 2], sizes = [2, 2], strides = [1, 1]} : vector<2x128xf32> to vector<2x2xf32>
    %13 = math.log %11 : vector<2x2xf32>
    %cst_6 = arith.constant -1.000000e+02 : f32
    %14 = vector.broadcast %cst_6 : f32 to vector<2x2xf32>
    %15 = arith.maximumf %13, %14 : vector<2x2xf32>
    %cst_7 = arith.constant 1.000000e+00 : f32
    %16 = vector.broadcast %cst_7 : f32 to vector<2x2xf32>
    %17 = arith.subf %16, %11 : vector<2x2xf32>
    %18 = math.log %17 : vector<2x2xf32>
    %cst_8 = arith.constant -1.000000e+02 : f32
    %19 = vector.broadcast %cst_8 : f32 to vector<2x2xf32>
    %20 = arith.maximumf %18, %19 : vector<2x2xf32>
    %21 = arith.mulf %12, %15 : vector<2x2xf32>
    %cst_9 = arith.constant 1.000000e+00 : f32
    %22 = vector.broadcast %cst_9 : f32 to vector<2x2xf32>
    %23 = arith.subf %22, %12 : vector<2x2xf32>
    %24 = arith.mulf %23, %20 : vector<2x2xf32>
    %25 = arith.addf %21, %24 : vector<2x2xf32>
    %cst_10 = arith.constant 0.000000e+00 : f32
    %26 = vector.broadcast %cst_10 : f32 to vector<2x2xf32>
    %27 = arith.subf %26, %25 : vector<2x2xf32>
    %28 = vector.extract_strided_slice %27 {offsets = [0, 0], sizes = [2, 1], strides = [1, 1]} : vector<2x2xf32> to vector<2x1xf32>
    %29 = vector.shape_cast %28 : vector<2x1xf32> to vector<1x2x1xf32>
    %cst_11 = arith.constant dense<0.000000e+00> : vector<1xf32>
    %30 = vector.multi_reduction <add>, %29, %cst_11 [1, 2] : vector<1x2x1xf32> to vector<1xf32>
    %31 = vector.shape_cast %30 : vector<1xf32> to vector<1x1x1xf32>
    %32 = vector.extract %31[0, 0, 0] : f32 from vector<1x1x1xf32>
    %33 = vector.extract_strided_slice %27 {offsets = [0, 1], sizes = [2, 1], strides = [1, 1]} : vector<2x2xf32> to vector<2x1xf32>
    %34 = vector.shape_cast %33 : vector<2x1xf32> to vector<1x2x1xf32>
    %cst_12 = arith.constant dense<0.000000e+00> : vector<1xf32>
    %35 = vector.multi_reduction <add>, %34, %cst_12 [1, 2] : vector<1x2x1xf32> to vector<1xf32>
    %36 = vector.shape_cast %35 : vector<1xf32> to vector<1x1x1xf32>
    %37 = vector.extract %36[0, 0, 0] : f32 from vector<1x1x1xf32>
    %38 = vector.extract_strided_slice %10 {offsets = [0, 4], sizes = [2, 3], strides = [1, 1]} : vector<2x128xf32> to vector<2x3xf32>
    %39 = vector.extract_strided_slice %10 {offsets = [0, 7], sizes = [2, 3], strides = [1, 1]} : vector<2x128xf32> to vector<2x3xf32>
    %40 = vector.extract_strided_slice %10 {offsets = [0, 10], sizes = [2, 3], strides = [1, 1]} : vector<2x128xf32> to vector<2x3xf32>
    %41 = vector.extract_strided_slice %10 {offsets = [0, 13], sizes = [2, 3], strides = [1, 1]} : vector<2x128xf32> to vector<2x3xf32>
    %42 = vector.extract_strided_slice %10 {offsets = [0, 3], sizes = [2, 1], strides = [1, 1]} : vector<2x128xf32> to vector<2x1xf32>
    %43 = arith.mulf %38, %40 : vector<2x3xf32>
    %44 = vector.extract_strided_slice %43 {offsets = [0, 0], sizes = [2, 1], strides = [1, 1]} : vector<2x3xf32> to vector<2x1xf32>
    %45 = vector.extract_strided_slice %43 {offsets = [0, 1], sizes = [2, 1], strides = [1, 1]} : vector<2x3xf32> to vector<2x1xf32>
    %46 = arith.addf %44, %45 : vector<2x1xf32>
    %47 = vector.extract_strided_slice %43 {offsets = [0, 2], sizes = [2, 1], strides = [1, 1]} : vector<2x3xf32> to vector<2x1xf32>
    %48 = arith.addf %46, %47 : vector<2x1xf32>
    %49 = arith.mulf %38, %38 : vector<2x3xf32>
    %50 = vector.extract_strided_slice %49 {offsets = [0, 0], sizes = [2, 1], strides = [1, 1]} : vector<2x3xf32> to vector<2x1xf32>
    %51 = vector.extract_strided_slice %49 {offsets = [0, 1], sizes = [2, 1], strides = [1, 1]} : vector<2x3xf32> to vector<2x1xf32>
    %52 = arith.addf %50, %51 : vector<2x1xf32>
    %53 = vector.extract_strided_slice %49 {offsets = [0, 2], sizes = [2, 1], strides = [1, 1]} : vector<2x3xf32> to vector<2x1xf32>
    %54 = arith.addf %52, %53 : vector<2x1xf32>
    %55 = math.sqrt %54 : vector<2x1xf32>
    %56 = arith.mulf %40, %40 : vector<2x3xf32>
    %57 = vector.extract_strided_slice %56 {offsets = [0, 0], sizes = [2, 1], strides = [1, 1]} : vector<2x3xf32> to vector<2x1xf32>
    %58 = vector.extract_strided_slice %56 {offsets = [0, 1], sizes = [2, 1], strides = [1, 1]} : vector<2x3xf32> to vector<2x1xf32>
    %59 = arith.addf %57, %58 : vector<2x1xf32>
    %60 = vector.extract_strided_slice %56 {offsets = [0, 2], sizes = [2, 1], strides = [1, 1]} : vector<2x3xf32> to vector<2x1xf32>
    %61 = arith.addf %59, %60 : vector<2x1xf32>
    %62 = math.sqrt %61 : vector<2x1xf32>
    %63 = arith.addf %55, %62 : vector<2x1xf32>
    %64 = math.absf %48 : vector<2x1xf32>
    %cst_13 = arith.constant 9.99999993E-9 : f32
    %65 = vector.broadcast %cst_13 : f32 to vector<2x1xf32>
    %66 = arith.addf %64, %65 : vector<2x1xf32>
    %cst_14 = arith.constant 9.99999993E-9 : f32
    %67 = vector.broadcast %cst_14 : f32 to vector<2x1xf32>
    %68 = arith.addf %63, %67 : vector<2x1xf32>
    %69 = arith.divf %66, %68 : vector<2x1xf32>
    %70 = vector.shape_cast %69 : vector<2x1xf32> to vector<1x2x1xf32>
    %cst_15 = arith.constant dense<0.000000e+00> : vector<1xf32>
    %71 = vector.multi_reduction <add>, %70, %cst_15 [1, 2] : vector<1x2x1xf32> to vector<1xf32>
    %72 = vector.shape_cast %71 : vector<1xf32> to vector<1x1x1xf32>
    %73 = vector.extract %72[0, 0, 0] : f32 from vector<1x1x1xf32>
    %cst_16 = arith.constant 0.000000e+00 : f32
    %74 = arith.subf %cst_16, %73 : f32
    %75 = arith.mulf %39, %41 : vector<2x3xf32>
    %76 = vector.extract_strided_slice %75 {offsets = [0, 0], sizes = [2, 1], strides = [1, 1]} : vector<2x3xf32> to vector<2x1xf32>
    %77 = vector.extract_strided_slice %75 {offsets = [0, 1], sizes = [2, 1], strides = [1, 1]} : vector<2x3xf32> to vector<2x1xf32>
    %78 = arith.addf %76, %77 : vector<2x1xf32>
    %79 = vector.extract_strided_slice %75 {offsets = [0, 2], sizes = [2, 1], strides = [1, 1]} : vector<2x3xf32> to vector<2x1xf32>
    %80 = arith.addf %78, %79 : vector<2x1xf32>
    %81 = arith.mulf %39, %39 : vector<2x3xf32>
    %82 = vector.extract_strided_slice %81 {offsets = [0, 0], sizes = [2, 1], strides = [1, 1]} : vector<2x3xf32> to vector<2x1xf32>
    %83 = vector.extract_strided_slice %81 {offsets = [0, 1], sizes = [2, 1], strides = [1, 1]} : vector<2x3xf32> to vector<2x1xf32>
    %84 = arith.addf %82, %83 : vector<2x1xf32>
    %85 = vector.extract_strided_slice %81 {offsets = [0, 2], sizes = [2, 1], strides = [1, 1]} : vector<2x3xf32> to vector<2x1xf32>
    %86 = arith.addf %84, %85 : vector<2x1xf32>
    %87 = math.sqrt %86 : vector<2x1xf32>
    %88 = arith.mulf %41, %41 : vector<2x3xf32>
    %89 = vector.extract_strided_slice %88 {offsets = [0, 0], sizes = [2, 1], strides = [1, 1]} : vector<2x3xf32> to vector<2x1xf32>
    %90 = vector.extract_strided_slice %88 {offsets = [0, 1], sizes = [2, 1], strides = [1, 1]} : vector<2x3xf32> to vector<2x1xf32>
    %91 = arith.addf %89, %90 : vector<2x1xf32>
    %92 = vector.extract_strided_slice %88 {offsets = [0, 2], sizes = [2, 1], strides = [1, 1]} : vector<2x3xf32> to vector<2x1xf32>
    %93 = arith.addf %91, %92 : vector<2x1xf32>
    %94 = math.sqrt %93 : vector<2x1xf32>
    %95 = arith.addf %87, %94 : vector<2x1xf32>
    %96 = math.absf %80 : vector<2x1xf32>
    %cst_17 = arith.constant 9.99999993E-9 : f32
    %97 = vector.broadcast %cst_17 : f32 to vector<2x1xf32>
    %98 = arith.addf %96, %97 : vector<2x1xf32>
    %cst_18 = arith.constant 9.99999993E-9 : f32
    %99 = vector.broadcast %cst_18 : f32 to vector<2x1xf32>
    %100 = arith.addf %95, %99 : vector<2x1xf32>
    %101 = arith.divf %98, %100 : vector<2x1xf32>
    %102 = vector.shape_cast %101 : vector<2x1xf32> to vector<1x2x1xf32>
    %cst_19 = arith.constant dense<0.000000e+00> : vector<1xf32>
    %103 = vector.multi_reduction <add>, %102, %cst_19 [1, 2] : vector<1x2x1xf32> to vector<1xf32>
    %104 = vector.shape_cast %103 : vector<1xf32> to vector<1x1x1xf32>
    %105 = vector.extract %104[0, 0, 0] : f32 from vector<1x1x1xf32>
    %cst_20 = arith.constant 0.000000e+00 : f32
    %106 = arith.subf %cst_20, %105 : f32
    %107 = vector.broadcast %42 : vector<2x1xf32> to vector<2x3xf32>
    %108 = arith.mulf %39, %107 : vector<2x3xf32>
    %109 = arith.mulf %38, %108 : vector<2x3xf32>
    %110 = vector.extract_strided_slice %109 {offsets = [0, 0], sizes = [2, 1], strides = [1, 1]} : vector<2x3xf32> to vector<2x1xf32>
    %111 = vector.extract_strided_slice %109 {offsets = [0, 1], sizes = [2, 1], strides = [1, 1]} : vector<2x3xf32> to vector<2x1xf32>
    %112 = arith.addf %110, %111 : vector<2x1xf32>
    %113 = vector.extract_strided_slice %109 {offsets = [0, 2], sizes = [2, 1], strides = [1, 1]} : vector<2x3xf32> to vector<2x1xf32>
    %114 = arith.addf %112, %113 : vector<2x1xf32>
    %115 = math.absf %114 : vector<2x1xf32>
    %116 = vector.shape_cast %115 : vector<2x1xf32> to vector<1x2x1xf32>
    %cst_21 = arith.constant dense<0.000000e+00> : vector<1xf32>
    %117 = vector.multi_reduction <add>, %116, %cst_21 [1, 2] : vector<1x2x1xf32> to vector<1xf32>
    %118 = vector.shape_cast %117 : vector<1xf32> to vector<1x1x1xf32>
    %119 = vector.extract %118[0, 0, 0] : f32 from vector<1x1x1xf32>
    %c0_22 = arith.constant 0 : index
    %120 = memref.load %arg0[%c0_22] : memref<6xf32, #tpu.memory_space<smem>>
    %121 = arith.mulf %120, %9 : f32
    %c1_23 = arith.constant 1 : index
    %122 = memref.load %arg0[%c1_23] : memref<6xf32, #tpu.memory_space<smem>>
    %123 = arith.mulf %122, %32 : f32
    %124 = arith.addf %121, %123 : f32
    %c2 = arith.constant 2 : index
    %125 = memref.load %arg0[%c2] : memref<6xf32, #tpu.memory_space<smem>>
    %126 = arith.mulf %125, %37 : f32
    %127 = arith.addf %124, %126 : f32
    %c3 = arith.constant 3 : index
    %128 = memref.load %arg0[%c3] : memref<6xf32, #tpu.memory_space<smem>>
    %129 = arith.mulf %128, %74 : f32
    %130 = arith.addf %127, %129 : f32
    %c4 = arith.constant 4 : index
    %131 = memref.load %arg0[%c4] : memref<6xf32, #tpu.memory_space<smem>>
    %132 = arith.mulf %131, %106 : f32
    %133 = arith.addf %130, %132 : f32
    %c5 = arith.constant 5 : index
    %134 = memref.load %arg0[%c5] : memref<6xf32, #tpu.memory_space<smem>>
    %135 = arith.mulf %134, %119 : f32
    %136 = arith.addf %133, %135 : f32
    %c0_24 = arith.constant 0 : index
    %137 = memref.load %arg3[%c0_24] : memref<7xf32, #tpu.memory_space<smem>>
    memref.store %136, %arg3[%c0_24] : memref<7xf32, #tpu.memory_space<smem>>
    %c1_25 = arith.constant 1 : index
    %138 = memref.load %arg3[%c1_25] : memref<7xf32, #tpu.memory_space<smem>>
    memref.store %9, %arg3[%c1_25] : memref<7xf32, #tpu.memory_space<smem>>
    %c2_26 = arith.constant 2 : index
    %139 = memref.load %arg3[%c2_26] : memref<7xf32, #tpu.memory_space<smem>>
    memref.store %32, %arg3[%c2_26] : memref<7xf32, #tpu.memory_space<smem>>
    %c3_27 = arith.constant 3 : index
    %140 = memref.load %arg3[%c3_27] : memref<7xf32, #tpu.memory_space<smem>>
    memref.store %37, %arg3[%c3_27] : memref<7xf32, #tpu.memory_space<smem>>
    %c4_28 = arith.constant 4 : index
    %141 = memref.load %arg3[%c4_28] : memref<7xf32, #tpu.memory_space<smem>>
    memref.store %74, %arg3[%c4_28] : memref<7xf32, #tpu.memory_space<smem>>
    %c5_29 = arith.constant 5 : index
    %142 = memref.load %arg3[%c5_29] : memref<7xf32, #tpu.memory_space<smem>>
    memref.store %106, %arg3[%c5_29] : memref<7xf32, #tpu.memory_space<smem>>
    %c6 = arith.constant 6 : index
    %143 = memref.load %arg3[%c6] : memref<7xf32, #tpu.memory_space<smem>>
    memref.store %119, %arg3[%c6] : memref<7xf32, #tpu.memory_space<smem>>
    return
  }
}

</mosaic_0001>

<bundles_post_ra>
// kernel: tpu_custom_call.1
= control target key start
LH: loop header
LB: loop body
LE: loop exit
PB: predicated region body
PF: predicated region fallthrough
CT: control target
= control target key end

     0   :  { %8 = vsyncpa [#allocation4], 0  ;;  %s433_s0 = inlined_call_operand.hbm [shape: f32[6], index: 0, kind: input, shape index: {}]   ;;  %s434_s1 = inlined_call_operand.hbm [shape: f32[2,4,128], index: 1, kind: input, shape index: {}]   ;;  %s435_s2 = inlined_call_operand.vmem [shape: f32[2,128], index: 2, kind: input, shape index: {}]   ;;  %s436_s3 = inlined_call_operand.hbm [shape: f32[7], index: 3, kind: output, shape index: {}]  }
   0x1   :  { %9 = vsyncpa [#allocation3], 0 }
   0x2   :  { %10 = vsyncpa [#allocation5], 0  ;;  %s293_s14 = scalar_lea.hbm %s433_s0, 16 }
   0x3   :  { %p294_p0 = scmp.ne.s32.totalorder %s433_s0, %s293_s14  ;;  %p297_p1 = scmp.lt.u32.totalorder %s293_s14, %s433_s0 }
   0x5   :  { %p299_p2 = pnand %p297_p1, %p294_p0 }
   0x7   :  { %302 = shalt.err (!%p299_p2)
}
   0x8   :  { %s341_s19 = smov [#allocation2]   ;;  %s342_s22 = smov [#allocation6]  }
   0x9   :  { %18 = dma.hbm_to_smem %s433_s0, 16, %s341_s19, [#allocation4]  }
   0xa   :  { %s24_s23 = sshll.u32 %s342_s22, 4  ;;  %s303_s26 = scalar_lea.hbm %s434_s1, 128  ;;  %s25_s23 = int_to_ptr.vmem [resolvable:$true] %s24_s23 }
   0xb   :  { %p304_p3 = scmp.ne.s32.totalorder %s434_s1, %s303_s26  ;;  %p307_p4 = scmp.lt.u32.totalorder %s303_s26, %s434_s1 }
   0xd   :  { %p309_p5 = pnand %p307_p4, %p304_p3 }
   0xf   :  { %312 = shalt.err (!%p309_p5)
}
  0x10   :  { %s313_s4 = scalar_lea.vmem %s25_s23, 128  ;;  %p318_p7 = scmp.lt.s32.totalorder %s25_s23, %s25_s23 }
  0x11   :  { %p314_p6 = scmp.ne.s32.totalorder %s25_s23, %s313_s4  ;;  %p319_p8 = scmp.lt.s32.totalorder %s313_s4, %s313_s4 }
  0x13   :  { %p320_p9 = por %p319_p8, %p318_p7 }
  0x15   :  { %p321_p10 = pnand %p320_p9, %p314_p6 }
  0x17   :  { %324 = shalt.err (!%p321_p10)
}
  0x18   :  { %s343_s0 = smov 64   ;;  %s344_s5 = smov 4  }
  0x19   :  { %30 = dma.hbm_to_vmem [thread:$0]  %s434_s1, 128, %s25_s23, [#allocation3], %s343_s0, %s343_s0, %s344_s5  }
  0x1a   :  { %335 = dma.done.wait [#allocation4], 16  }
  0x1b   :  { %336 = vsyncadd [#allocation4], 4294967280 }
  0x1c   :  { %337 = dma.done.wait [#allocation3], 128  }
  0x1d   :  { %338 = vsyncadd [#allocation3], 4294967168 }
  0x1e   :  { %39 = sfence }
  0x1f   :  { %v56_v0 = vld [vmem:[%s435_s2] sm:$0x3]  ;;  %v345_v1 = vmov 3   ;;  %s346_s10 = smov 126   ;;  %s347_s11 = smov 127   ;;  %vm45_vm2 = vcmask 1043456  }
  0x20   :  { %284 = vset.pattern.permute.xlu0 %v345_v1  ;;  %v118_v2 = vmul.f32 %v56_v0, %v56_v0  ;;  %s348_s1 = smov 122   ;;  %v60_v3 = vsub.f32 1.0, %v56_v0  ;;  %s349_s2 = smov 125   ;;  %v40_v42 = vld [vmem:[#allocation6] sm:$0xf]  ;;  %vm80_vm3 = vcmask 1024  }
  0x21   :  { %175 = vperm.xlu0 %284, %v56_v0   ;;  %s350_s12 = smov 2   ;;  %s351_s13 = smov 121   ;;  %v42_v43 = vld [vmem:[#allocation6 + $0x4] sm:$0xf] }
  0x22   :  { %124 = vrot.lane.b32.xlu1 %v118_v2, %s346_s10  ;;  %285 = vlog2.f32 %v60_v3  ;;  %s352_s14 = smov 124   ;;  %v43_v44 = vsub.f32 %v40_v42, %v42_v43  ;;  %s208_s16 = sld [smem:[#allocation2]] }
  0x23   :  { %287 = vlog2.f32 %v56_v0  ;;  %s254_s17 = sld [smem:[#allocation2 + $0x1]]  ;;  %s255_s18 = sld [smem:[#allocation2 + $0x2]] }
  0x24   :  { %v44_v45 = vmul.f32 %v43_v44, %v43_v44  ;;  %s256_s22 = sld [smem:[#allocation2 + $0x3]]  ;;  %s257_s24 = sld [smem:[#allocation2 + $0x4]] }
  0x25   :  { %120 = vrot.lane.b32.xlu0 %v118_v2, %s347_s11  ;;  %s258_s8 = sld [smem:[#allocation2 + $0x5]] }
  0x26   :  { %105 = vrot.lane.b32.xlu1 %v56_v0, %s348_s1  ;;  %v46_v46 = vsel %vm45_vm2, %v44_v45, 0.0 }
  0x2c   :  { %v286_v5 = vpop.eup %285 }
  0x2d   :  { %v62_v10 = vmul.f32 0.6931472, %v286_v5  ;;  %v288_v15 = vpop.eup %287 }
  0x2e   :  { %v58_v19 = vmul.f32 0.6931472, %v288_v15 }
  0x2f   :  { %v63_v14 = vmax.f32 %v62_v10, -100.0 }
  0x30   :  { %v59_v22 = vmax.f32 %v58_v19, -100.0 }
  0x94   :  { %v125_v4 = vpop.permute.xlu1 %124 }
  0x98   :  { %v106_v7 = vpop.permute.xlu1 %105 }
  0x99   :  { %v108_v9 = vmul.f32 %v106_v7, %v56_v0 }
  0xa0   :  { %v176_v6 = vpop.permute.xlu0 %175 }
  0xa1   :  { %v178_v8 = vmul.f32 %v176_v6, %v56_v0 }
  0xa3   :  { %180 = vrot.lane.b32.xlu0 %v178_v8, %s349_s2 }
  0xa4   :  { %v121_v11 = vpop.permute.xlu0 %120 }
  0xa5   :  { %v123_v12 = vadd.f32 %v121_v11, %v118_v2 }
  0xa7   :  { %v127_v13 = vadd.f32 %v125_v4, %v123_v12  ;;  %110 = vrot.lane.b32.xlu0 %v108_v9, %s347_s11 }
  0xa9   :  { %289 = vrsqrt.f32 %v127_v13  ;;  %vm130_vm0 = vcmp.eq.f32.partialorder %v127_v13, inf  ;;  %v133_v17 = vand.u32 2147483648, %v127_v13  ;;  %vm132_vm1 = vcmp.eq.f32.partialorder %v127_v13, 0.0 }
  0xab   :  { %70 = vrot.lane.b32.xlu0 %v63_v14, %s350_s12 }
  0xb3   :  { %v290_v16 = vpop.eup %289 }
  0xb4   :  { %v129_v18 = vmul.f32 %v290_v16, %v127_v13 }
  0xb6   :  { %v131_v20 = vsel %vm130_vm0, %v127_v13, %v129_v18 }
  0xb7   :  { %v134_v21 = vsel %vm132_vm1, %v133_v17, %v131_v20 }
  0xb8   :  { %136 = vrot.lane.b32.xlu1 %v134_v21, %s348_s1 }
  0xbc   :  { %65 = vrot.lane.b32.xlu1 %v59_v22, %s350_s12  ;;  %s325_s12 = scalar_lea.hbm %s436_s3, 16 }
  0xbd   :  { %p326_p11 = scmp.ne.s32.totalorder %s436_s3, %s325_s12  ;;  %p329_p12 = scmp.lt.u32.totalorder %s325_s12, %s436_s3 }
  0xbf   :  { %p331_p13 = pnand %p329_p12, %p326_p11 }
  0xc0   :  { %114 = vrot.lane.b32.xlu1 %v108_v9, %s346_s10 }
 0x115   :  { %v181_v23 = vpop.permute.xlu0 %180 }
 0x116   :  { %v183_v24 = vmul.f32 %v181_v23, %v56_v0 }
 0x118   :  { %185 = vrot.lane.b32.xlu0 %v183_v24, %s347_s11  ;;  %189 = vrot.lane.b32.xlu1 %v183_v24, %s346_s10 }
 0x119   :  { %v111_v25 = vpop.permute.xlu0 %110 }
 0x11a   :  { %v113_v33 = vadd.f32 %v111_v25, %v108_v9 }
 0x11d   :  { %v71_v27 = vpop.permute.xlu0 %70 }
 0x11e   :  { %v73_v30 = vmul.f32 %v71_v27, %v60_v3 }
 0x12a   :  { %v137_v26 = vpop.permute.xlu1 %136 }
 0x12b   :  { %v139_v28 = vadd.f32 %v137_v26, %v134_v21 }
 0x12d   :  { %v142_v29 = vadd.f32 1e-08, %v139_v28 }
 0x12e   :  { %v66_v31 = vpop.permute.xlu1 %65 }
 0x12f   :  { %291 = vrcp.f32 %v142_v29  ;;  %v68_v32 = vmul.f32 %v66_v31, %v56_v0 }
 0x131   :  { %v74_v34 = vadd.f32 %v73_v30, %v68_v32 }
 0x132   :  { %v115_v35 = vpop.permute.xlu1 %114 }
 0x133   :  { %v75_v36 = vsub.f32 0.0, %v74_v34  ;;  %v117_v37 = vadd.f32 %v115_v35, %v113_v33 }
 0x135   :  { %v140_v38 = vand.u32 2147483647, %v117_v37  ;;  %91 = vrot.lane.b32.xlu1 %v75_v36, %s349_s2  ;;  %77 = vrot.lane.b32.xlu0 %v75_v36, %s346_s10 }
 0x137   :  { %v141_v39 = vadd.f32 1e-08, %v140_v38 }
 0x139   :  { %v292_v40 = vpop.eup %291 }
 0x13a   :  { %v144_v41 = vmul.f32 %v292_v40, %v141_v39 }
 0x13c   :  { %160 = vrot.lane.b32.xlu1 %v144_v41, %s351_s13  ;;  %146 = vrot.lane.b32.xlu0 %v144_v41, %s352_s14 }
 0x160   :  { %47 = vadd.xlane.f32.xlu1 %v46_v46 }
 0x18a   :  { %v186_v47 = vpop.permute.xlu0 %185  ;;  %v190_v49 = vpop.permute.xlu1 %189 }
 0x18b   :  { %v188_v48 = vadd.f32 %v186_v47, %v183_v24 }
 0x18d   :  { %v192_v50 = vadd.f32 %v190_v49, %v188_v48 }
 0x18f   :  { %v193_v51 = vand.u32 2147483647, %v192_v50 }
 0x191   :  { %195 = vrot.lane.b32.xlu0 %v193_v51, %s352_s14 }
 0x1a7   :  { %v78_v52 = vpop.permute.xlu0 %77  ;;  %v92_v54 = vpop.permute.xlu1 %91 }
 0x1a8   :  { %v81_v53 = vsel %vm80_vm3, %v78_v52, 0.0  ;;  %v94_v57 = vsel %vm80_vm3, %v92_v54, 0.0 }
 0x1ae   :  { %v147_v55 = vpop.permute.xlu0 %146  ;;  %v161_v58 = vpop.permute.xlu1 %160 }
 0x1af   :  { %v149_v56 = vsel %vm80_vm3, %v147_v55, 0.0  ;;  %v163_v59 = vsel %vm80_vm3, %v161_v58, 0.0 }
 0x1b0   :  { %82 = vadd.xlane.f32.xlu0 %v81_v53  ;;  %150 = vadd.xlane.f32.xlu1 %v149_v56 }
 0x1b4   :  { %95 = vadd.xlane.f32.xlu0 %v94_v57 }
 0x1b8   :  { %164 = vadd.xlane.f32.xlu0 %v163_v59 }
 0x1ed   :  { %v48_v60 = vpop.xlane.xlu1 %47 }
 0x1ee   :  { %v49_v61 = vrot.slane %v48_v60, 4 }
 0x1f0   :  { %v50_v62 = vadd.f32 %v49_v61, %v48_v60 }
 0x1f2   :  { %v51_v63 = vrot.slane %v50_v62, 2 }
 0x1f4   :  { %v52_v0 = vadd.f32 %v51_v63, %v50_v62 }
 0x1f6   :  { %v53_v1 = vrot.slane %v52_v0, 1 }
 0x1f8   :  { %v54_v2 = vadd.f32 %v53_v1, %v52_v0 }
 0x1fa   :  { %259 = vpush %v54_v2 }
 0x203   :  { %v196_v3 = vpop.permute.xlu0 %195 }
 0x204   :  { %v198_v4 = vsel %vm80_vm3, %v196_v3, 0.0 }
 0x205   :  { %199 = vadd.xlane.f32.xlu1 %v198_v4 }
 0x22b   :  { %s417_s15 = spop %259 }
 0x22c   :  { %228 = sst [smem:[#allocation7 + $0x1]] %s417_s15  ;;  %s209_s19 = smul.f32 %s417_s15, %s208_s16 }
 0x23d   :  { %v83_v5 = vpop.xlane.xlu0 %82  ;;  %v151_v6 = vpop.xlane.xlu1 %150 }
 0x23e   :  { %v84_v7 = vrot.slane %v83_v5, 4  ;;  %v152_v8 = vrot.slane %v151_v6, 4 }
 0x240   :  { %v85_v9 = vadd.f32 %v84_v7, %v83_v5  ;;  %v153_v10 = vadd.f32 %v152_v8, %v151_v6 }
 0x241   :  { %v96_v11 = vpop.xlane.xlu0 %95 }
 0x242   :  { %v86_v12 = vrot.slane %v85_v9, 2  ;;  %v154_v13 = vrot.slane %v153_v10, 2  ;;  %v97_v14 = vrot.slane %v96_v11, 4 }
 0x244   :  { %v98_v15 = vadd.f32 %v97_v14, %v96_v11  ;;  %v87_v16 = vadd.f32 %v86_v12, %v85_v9  ;;  %v155_v18 = vadd.f32 %v154_v13, %v153_v10 }
 0x245   :  { %v165_v17 = vpop.xlane.xlu0 %164 }
 0x246   :  { %v99_v19 = vrot.slane %v98_v15, 2  ;;  %v166_v20 = vrot.slane %v165_v17, 4  ;;  %v88_v21 = vrot.slane %v87_v16, 1  ;;  %v156_v25 = vrot.slane %v155_v18, 1 }
 0x248   :  { %v167_v22 = vadd.f32 %v166_v20, %v165_v17  ;;  %v89_v23 = vadd.f32 %v88_v21, %v87_v16  ;;  %v100_v24 = vadd.f32 %v99_v19, %v98_v15  ;;  %v157_v30 = vadd.f32 %v156_v25, %v155_v18 }
 0x24a   :  { %v168_v26 = vrot.slane %v167_v22, 2  ;;  %261 = vpush %v89_v23  ;;  %v101_v27 = vrot.slane %v100_v24, 1 }
 0x24c   :  { %v169_v28 = vadd.f32 %v168_v26, %v167_v22  ;;  %v102_v29 = vadd.f32 %v101_v27, %v100_v24 }
 0x24e   :  { %263 = vpush %v102_v29  ;;  %v170_v31 = vrot.slane %v169_v28, 1 }
 0x24f   :  { %265 = vpush %v157_v30 }
 0x250   :  { %v171_v32 = vadd.f32 %v170_v31, %v169_v28 }
 0x252   :  { %267 = vpush %v171_v32 }
 0x27b   :  { %s262_s20 = spop %261 }
 0x27c   :  { %s211_s21 = smul.f32 %s262_s20, %s254_s17  ;;  %230 = sst [smem:[#allocation7 + $0x2]] %s262_s20 }
 0x27e   :  { %s212_s23 = sadd.f32 %s211_s21, %s209_s19 }
 0x27f   :  { %s264_s25 = spop %263 }
 0x280   :  { %s214_s26 = smul.f32 %s264_s25, %s255_s18  ;;  %232 = sst [smem:[#allocation7 + $0x3]] %s264_s25 }
 0x281   :  { %s266_s27 = spop %265 }
 0x282   :  { %s215_s28 = sadd.f32 %s214_s26, %s212_s23 }
 0x283   :  { %s159_s29 = ssub.f32 0.0, %s266_s27  ;;  %s268_s30 = spop %267 }
 0x284   :  { %s173_s4 = ssub.f32 0.0, %s268_s30 }
 0x285   :  { %s217_s0 = smul.f32 %s256_s22, %s159_s29  ;;  %234 = sst [smem:[#allocation7 + $0x4]] %s159_s29 }
 0x286   :  { %s220_s5 = smul.f32 %s257_s24, %s173_s4  ;;  %236 = sst [smem:[#allocation7 + $0x5]] %s173_s4 }
 0x287   :  { %s218_s6 = sadd.f32 %s217_s0, %s215_s28 }
 0x289   :  { %s221_s7 = sadd.f32 %s220_s5, %s218_s6 }
 0x292   :  { %v200_v33 = vpop.xlane.xlu1 %199 }
 0x293   :  { %v201_v34 = vrot.slane %v200_v33, 4 }
 0x295   :  { %v202_v35 = vadd.f32 %v201_v34, %v200_v33 }
 0x297   :  { %v203_v36 = vrot.slane %v202_v35, 2 }
 0x299   :  { %v204_v37 = vadd.f32 %v203_v36, %v202_v35 }
 0x29b   :  { %v205_v38 = vrot.slane %v204_v37, 1 }
 0x29d   :  { %v206_v39 = vadd.f32 %v205_v38, %v204_v37 }
 0x29f   :  { %269 = vpush %v206_v39 }
 0x2d0   :  { %s270_s9 = spop %269 }
 0x2d1   :  { %s223_s10 = smul.f32 %s270_s9, %s258_s8  ;;  %238 = sst [smem:[#allocation7 + $0x6]] %s270_s9 }
 0x2d3   :  { %s224_s11 = sadd.f32 %s223_s10, %s221_s7 }
 0x2d5   :  { %226 = sst [smem:[#allocation7]] %s224_s11 }
 0x2d6   :  { %334 = shalt.err (!%p331_p13)
}
 0x2d7   :  { %s353_s17 = smov [#allocation7]  }
 0x2d8   :  { %246 = dma.smem_to_hbm %s353_s17, 16, %s436_s3, [#allocation5]  }
 0x2d9   :  { %339 = dma.done.wait [#allocation5], 16  }
 0x2da   :  { %340 = vsyncadd [#allocation5], 4294967280 }
 0x2db   :  { %250 = sfence }
 0x2dc   :  { %251 = vsyncpa [#allocation3], 1 }
 0x2dd   :  { %252 = vsyncpa [#allocation4], 1 }
 0x2de   :  { %253 = vsyncpa [#allocation5], 1 }

</bundles_post_ra>
